<compile_context>
chip_gen: v5e
topology: v5e:2x2
jax: 0.10.0
libtpu: 0.0.40
codegen_flags: <defaults>
</compile_context>

<pallas_src>
import math

import jax
import jax.numpy as jnp
from jax.experimental import pallas as pl
from jax.experimental.pallas import tpu as pltpu


def _round_up(x, m):
    return (x + m - 1) // m * m


def _cdiv(a, b):
    return (a + b - 1) // b


def _proj_kernel(x_ref, w_ref, o_ref):
    # One MXU matmul per M-tile: bf16 operands, f32 accumulate, store in output dtype.
    o_ref[...] = jnp.dot(
        x_ref[...], w_ref[...], preferred_element_type=jnp.float32
    ).astype(o_ref.dtype)


def proj_matmul(x_big, w_big, *, tile_p, out_dtype=jnp.float32):
    """x_big: (M0_pad, nw*K_pad) bf16, w_big: (nw*K_pad, nw*N) bf16.

    Returns (M0_pad, nw*N) `out_dtype`.  M0_pad must be a multiple of tile_p.
    """
    Mp, Kb = x_big.shape
    Kb2, Nb = w_big.shape
    assert Kb == Kb2 and Mp % tile_p == 0

    out_itemsize = jnp.dtype(out_dtype).itemsize
    cost = pl.CostEstimate(
        flops=2 * Mp * Kb * Nb,
        transcendentals=0,
        bytes_accessed=(x_big.size * x_big.dtype.itemsize
                        + w_big.size * w_big.dtype.itemsize
                        + Mp * Nb * out_itemsize),
    )

    return pl.pallas_call(
        _proj_kernel,
        out_shape=jax.ShapeDtypeStruct((Mp, Nb), out_dtype),
        grid_spec=pltpu.PrefetchScalarGridSpec(
            num_scalar_prefetch=0,
            grid=(Mp // tile_p,),
            in_specs=[
                pl.BlockSpec((tile_p, Kb), lambda i: (i, 0)),   # streamed M tiles
                pl.BlockSpec((Kb, Nb), lambda i: (0, 0)),       # resident weight
            ],
            out_specs=pl.BlockSpec((tile_p, Nb), lambda i: (i, 0)),
        ),
        compiler_params=pltpu.CompilerParams(
            dimension_semantics=("parallel",),            # megacore-shardable
            vmem_limit_bytes=32 * 1024 * 1024,            # explicit: v5e default is 16 MiB
        ),
        cost_estimate=cost,
    )(x_big, w_big)


def _choose_tiling(M0, target_patches):
    """Pick (tile_p, M0_pad) so tiles are big (amortize ~0.35us/step), padding waste
    stays <16 rows/step, and large M0 gets >=2 steps for v7x's two TensorCores."""
    target = max(16, min(int(target_patches), 4096))   # 4096 keeps working set <~20 MiB
    n_steps = max(1, _cdiv(M0, target))
    if M0 >= 2048 and n_steps < 2:
        n_steps = 2                                     # both v7x TCs get work
    tile_p = _round_up(_cdiv(M0, n_steps), 16)          # bf16 sublane-friendly
    M0_pad = n_steps * tile_p
    return tile_p, M0_pad


class PatchEmbedPallas:
    """JAX/Pallas port of TNT.PatchEmbed (conv proj done as im2col + MXU matmul)."""

    def __init__(self, img_size=16, patch_size=8, in_chans=4,
                 inner_dim=32, inner_stride=4, key=None):
        self.img_size = (img_size, img_size)
        self.patch_size = (patch_size, patch_size)
        self.num_patches = (img_size // patch_size) * (img_size // patch_size)
        self.inner_dim = inner_dim
        self.inner_stride = inner_stride
        self.num_words = (math.ceil(patch_size / inner_stride)
                          * math.ceil(patch_size / inner_stride))
        self.in_chans = in_chans

        # nn.Conv2d(in_chans, inner_dim, kernel_size=7, padding=3, stride=inner_stride)
        # Deterministic PyTorch-style uniform init (synthetic weights).
        kw, kb = jax.random.split(key)
        self.K = in_chans * 7 * 7
        bound = 1.0 / math.sqrt(self.K)
        self.weight = jax.random.uniform(
            kw, (inner_dim, in_chans, 7, 7), jnp.float32, -bound, bound)
        self.bias = jax.random.uniform(
            kb, (inner_dim,), jnp.float32, -bound, bound)

        # --- Precompute the padded / block-diagonal projection matrix (bf16). ---
        # K padded so num_words*K_pad is a multiple of 128 lanes; column K is the
        # "ones" bias column, remaining pad columns are zero.  224 instead of 256
        # cuts ~12.5% of the streamed X bytes (memory-bound kernel).
        self.K_pad = _round_up(self.K + 1, 32)                     # 196 -> 224
        assert (self.num_words * self.K_pad) % 128 == 0
        w_mat = self.weight.reshape(inner_dim, self.K).T           # (K, N)
        w_aug = jnp.zeros((self.K_pad, inner_dim), jnp.float32)
        w_aug = w_aug.at[:self.K, :].set(w_mat)
        w_aug = w_aug.at[self.K, :].set(self.bias)                 # folded bias row
        # Block-diagonal over the num_words visual-word positions, so one patch's
        # num_words * inner_dim outputs land in one lane-dense 128-wide output row.
        self.w_big = jnp.kron(
            jnp.eye(self.num_words, dtype=jnp.float32), w_aug
        ).astype(jnp.bfloat16)                                     # (nw*K_pad, nw*N)

    def _im2col(self, x, M0_pad):
        """x: (B,C,H,W) -> (M0_pad, num_words*K_pad) bf16 with folded bias column.

        The M-padding to M0_pad is folded into this producer so XLA writes x_big
        exactly once (no post-materialization jnp.pad copy of the hot operand).
        """
        B, C, H, W = x.shape
        ph, pw = self.patch_size
        nH, nW = H // ph, W // pw
        s = self.inner_stride

        # nn.Unfold(kernel=patch, stride=patch) + transpose + reshape (torch order).
        patches = x.reshape(B, C, nH, ph, nW, pw).transpose(0, 2, 4, 1, 3, 5)
        patches = patches.reshape(B * nH * nW, C, ph, pw)

        # im2col of conv(kernel=7, padding=3, stride=s) applied per patch.
        padded = jnp.pad(patches, ((0, 0), (0, 0), (3, 3), (3, 3)))
        out_h = (ph + 6 - 7) // s + 1
        out_w = (pw + 6 - 7) // s + 1
        cols = []
        for oy in range(out_h):              # oy-major, ox-minor == torch word order
            for ox in range(out_w):
                win = padded[:, :, oy * s:oy * s + 7, ox * s:ox * s + 7]
                cols.append(win.reshape(win.shape[0], -1))          # (M0, C*49)
        x_cols = jnp.stack(cols, axis=1)                            # (M0, nw, K)
        M0 = x_cols.shape[0]
        assert x_cols.shape[1] == self.num_words

        if M0_pad > M0:                                             # fold M padding here
            x_cols = jnp.pad(x_cols, ((0, M0_pad - M0), (0, 0), (0, 0)))

        ones = jnp.ones((M0_pad, self.num_words, 1), x_cols.dtype)  # bias column
        zeros = jnp.zeros((M0_pad, self.num_words, self.K_pad - self.K - 1),
                          x_cols.dtype)
        x_cols = jnp.concatenate([x_cols, ones, zeros], axis=-1)    # (M0_pad, nw, K_pad)
        x_big = x_cols.reshape(M0_pad, self.num_words * self.K_pad)
        return x_big.astype(jnp.bfloat16)

    def __call__(self, x, *, tile_patches=2048):
        B, C, H, W = x.shape
        assert H == self.img_size[0] and W == self.img_size[1], \
            f"Input image size ({H}*{W}) doesn't match model {self.img_size}."

        M0 = B * self.num_patches
        tile_p, M0_pad = _choose_tiling(M0, tile_patches)

        x_big = self._im2col(x, M0_pad)                 # (M0_pad, nw*K_pad) bf16
        out = proj_matmul(x_big, self.w_big, tile_p=tile_p)  # (M0_pad, nw*inner_dim) f32
        out = out[:M0]
        # Row-major view: (M0, nw*inner_dim) -> (M0, num_words, inner_dim), free.
        return out.reshape(M0, self.num_words, self.inner_dim)


def reference_forward(x, mod):
    """Pure-JAX reference matching the PyTorch module exactly (f32)."""
    B, C, H, W = x.shape
    ph, pw = mod.patch_size
    nH, nW = H // ph, W // pw
    s = mod.inner_stride
    patches = x.reshape(B, C, nH, ph, nW, pw).transpose(0, 2, 4, 1, 3, 5)
    patches = patches.reshape(B * nH * nW, C, ph, pw)
    conv = jax.lax.conv_general_dilated(
        patches, mod.weight, window_strides=(s, s),
        padding=((3, 3), (3, 3)),
        dimension_numbers=("NCHW", "OIHW", "NCHW"))
    conv = conv + mod.bias.reshape(1, -1, 1, 1)
    M0 = conv.shape[0]
    return conv.reshape(M0, mod.inner_dim, -1).transpose(0, 2, 1)


if __name__ == "__main__":
    key = jax.random.PRNGKey(0)
    kx, kp, kx2 = jax.random.split(key, 3)

    # B=2, C=4, img_size=16, patch_size=8, inner_dim=32, inner_stride=4
    # -> num_patches=4, num_words=4, output (8, 4, 32)
    mod = PatchEmbedPallas(img_size=16, patch_size=8, in_chans=4,
                           inner_dim=32, inner_stride=4, key=kp)

    # Primary check (spec shapes).
    x = jax.random.normal(kx, (2, 4, 16, 16), jnp.float32)
    y = jax.block_until_ready(mod(x))
    y_ref = reference_forward(x, mod)
    assert y.shape == (2 * mod.num_patches, mod.num_words, mod.inner_dim), y.shape
    # bf16 MXU operands with f32 accumulation -> loosen tolerance vs f32 reference.
    assert jnp.allclose(y, y_ref, atol=5e-2, rtol=5e-2), \
        float(jnp.max(jnp.abs(y - y_ref)))

    # Secondary check: larger batch with a small tile target so the M grid actually
    # runs multiple pipelined steps and the folded patch-row padding is exercised.
    x2 = jax.random.normal(kx2, (10, 4, 16, 16), jnp.float32)
    y2 = jax.block_until_ready(mod(x2, tile_patches=16))   # M0=40 -> tile_p=16, grid=(3,)
    y2_ref = reference_forward(x2, mod)
    assert y2.shape == (10 * mod.num_patches, mod.num_words, mod.inner_dim), y2.shape
    assert jnp.allclose(y2, y2_ref, atol=5e-2, rtol=5e-2), \
        float(jnp.max(jnp.abs(y2 - y2_ref)))

    print("KERNEL_OK")
</pallas_src>

<mosaic_0001>
module attributes {stable_mosaic.version = 11 : i64} {
  func.func @_proj_kernel(%arg0: i32, %arg1: memref<16x896xbf16, #tpu.memory_space<vmem>>, %arg2: memref<896x128xbf16, #tpu.memory_space<vmem>>, %arg3: memref<16x128xf32, #tpu.memory_space<vmem>>) attributes {dimension_semantics = [#tpu.dimension_semantics<parallel>], iteration_bounds = array<i64: 1>, scalar_prefetch = 0 : i64, scratch_operands = 0 : i64, tpu.core_type = #tpu.core_type<tc>, window_params = [{transform_indices = @transform_0, window_bounds = array<i64: 16, 896>}, {pipeline_mode = #tpu.pipeline_mode<synchronous>, transform_indices = @transform_1, window_bounds = array<i64: 896, 128>}, {transform_indices = @transform_2, window_bounds = array<i64: 16, 128>}]} {
    %c0 = arith.constant 0 : index
    %c0_0 = arith.constant 0 : index
    %0 = vector.load %arg1[%c0, %c0_0] : memref<16x896xbf16, #tpu.memory_space<vmem>>, vector<16x896xbf16>
    %c0_1 = arith.constant 0 : index
    %c0_2 = arith.constant 0 : index
    %1 = vector.load %arg2[%c0_1, %c0_2] : memref<896x128xbf16, #tpu.memory_space<vmem>>, vector<896x128xbf16>
    %cst = arith.constant dense<0.000000e+00> : vector<16x128xf32>
    %2 = tpu.matmul %0, %1, %cst {dimension_numbers = #tpu.dot_dimension_numbers<[1], [0], [0], [1], [0, 0, 1, 1], [], []>} : vector<16x896xbf16>, vector<896x128xbf16>, vector<16x128xf32> -> vector<16x128xf32>
    %c0_3 = arith.constant 0 : index
    %c0_4 = arith.constant 0 : index
    %3 = vector.load %arg3[%c0_3, %c0_4] : memref<16x128xf32, #tpu.memory_space<vmem>>, vector<16x128xf32>
    tpu.vector_store %arg3[%c0_3, %c0_4], %2 {strides = array<i32>} : memref<16x128xf32, #tpu.memory_space<vmem>>, vector<16x128xf32>,
    return
  }
  func.func @transform_0(%arg0: i32) -> (i32, i32) {
    %c0_i32 = arith.constant 0 : i32
    %c0_i32_0 = arith.constant 0 : i32
    return %arg0, %c0_i32 : i32, i32
  }
  func.func @transform_1(%arg0: i32) -> (i32, i32) {
    %c0_i32 = arith.constant 0 : i32
    %c0_i32_0 = arith.constant 0 : i32
    %c0_i32_1 = arith.constant 0 : i32
    return %c0_i32, %c0_i32_0 : i32, i32
  }
  func.func @transform_2(%arg0: i32) -> (i32, i32) {
    %c0_i32 = arith.constant 0 : i32
    %c0_i32_0 = arith.constant 0 : i32
    return %arg0, %c0_i32 : i32, i32
  }
}

</mosaic_0001>

<bundles_post_ra>
// kernel: tpu_custom_call.1
= control target key start
LH: loop header
LB: loop body
LE: loop exit
PB: predicated region body
PF: predicated region fallthrough
CT: control target
= control target key end

     0   :  { %7 = vsyncpa [#allocation3], 0  ;;  %s1091_s0 = inlined_call_operand.hbm [shape: bf16[16,896], index: 0, kind: input, shape index: {}]   ;;  %s1092_s1 = inlined_call_operand.hbm [shape: bf16[896,128], index: 1, kind: input, shape index: {}]   ;;  %s1093_s2 = inlined_call_operand.hbm [shape: f32[16,128], index: 2, kind: output, shape index: {}]  }
   0x1   :  { %8 = vsyncpa [#allocation6], 0 }
   0x2   :  { %9 = vsyncpa [#allocation4], 0  ;;  %s14_s11 = sshll.u32 %s1091_s0, 4  ;;  %s1058_s12 = smov [#allocation2]   ;;  %s15_s11 = int_to_ptr.hbm [resolvable:$true] %s14_s11 }
   0x3   :  { %s16_s13 = sshll.u32 %s1058_s12, 4  ;;  %s27_s16 = sshll.u32 %s1092_s1, 4  ;;  %s17_s13 = int_to_ptr.vmem [resolvable:$true] %s16_s13  ;;  %s28_s16 = int_to_ptr.hbm [resolvable:$true] %s27_s16 }
   0x4   :  { %s1059_s17 = smov 448   ;;  %s1060_s18 = smov 28  }
   0x5   :  { %22 = dma.hbm_to_vmem [thread:$0]  %s15_s11, 896, %s17_s13, [#allocation3], %s1059_s17, %s1059_s17, %s1060_s18  }
   0x6   :  { %s1061_s19 = smov [#allocation5]   ;;  %s1062_s21 = smov 64  }
   0x7   :  { %s29_s20 = sshll.u32 %s1061_s19, 4  ;;  %s1063_s22 = smov 4   ;;  %s30_s20 = int_to_ptr.vmem [resolvable:$true] %s29_s20 }
   0x8   :  { %35 = dma.hbm_to_vmem [thread:$0]  %s28_s16, 7168, %s30_s20, [#allocation6], %s1062_s21, %s1062_s21, %s1063_s22  }
   0x9   :  { %1052 = dma.done.wait [#allocation3], 896  }
   0xa   :  { %1053 = vsyncadd [#allocation3], 4294966400 }
   0xb   :  { %1054 = dma.done.wait [#allocation6], 7168  }
   0xc   :  { %1055 = vsyncadd [#allocation6], 4294960128  ;;  %v922_v0 = vld [vmem:[#allocation5 + $0x38] sm:$0xff]  ;;  %v921_v3 = vld [vmem:[#allocation5 + $0x30] sm:$0xff]  ;;  %s1064_s0 = smov [#allocation7]   ;;  %s642_s25 = sshll.u32 %s1093_s2, 4  ;;  %s643_s25 = int_to_ptr.hbm [resolvable:$true] %s642_s25 }
   0xd   :  { %v930_v1 = vld [vmem:[#allocation5 + $0x78] sm:$0xff]  ;;  %536 = vmatpush.bf16.msra.mxu0 %v922_v0  ;;  %v929_v4 = vld [vmem:[#allocation5 + $0x70] sm:$0xff]  ;;  %v920_v8 = vld [vmem:[#allocation5 + $0x28] sm:$0xff]  ;;  %s640_s1 = sshll.u32 %s1064_s0, 4  ;;  %s1065_s26 = smov 128   ;;  %s641_s1 = int_to_ptr.vmem [resolvable:$true] %s640_s1 }
   0xe   :  { %v938_v2 = vld [vmem:[#allocation5 + $0xb8] sm:$0xff]  ;;  %550 = vmatpush.bf16.msra.mxu1 %v930_v1  ;;  %v937_v6 = vld [vmem:[#allocation5 + $0xb0] sm:$0xff]  ;;  %v928_v9 = vld [vmem:[#allocation5 + $0x68] sm:$0xff]  ;;  %s1066_s27 = smov 8  }
   0xf   :  { %v946_v5 = vld [vmem:[#allocation5 + $0xf8] sm:$0xff]  ;;  %564 = vmatpush.bf16.msra.mxu2 %v938_v2  ;;  %v945_v7 = vld [vmem:[#allocation5 + $0xf0] sm:$0xff]  ;;  %v936_v10 = vld [vmem:[#allocation5 + $0xa8] sm:$0xff] }
  0x10   :  { %578 = vmatpush.bf16.msra.mxu3 %v946_v5  ;;  %v944_v11 = vld [vmem:[#allocation5 + $0xe8] sm:$0xff]  ;;  %v919_v12 = vld [vmem:[#allocation5 + $0x20] sm:$0xff]  ;;  %v918_v16 = vld [vmem:[#allocation5 + $0x18] sm:$0xff] }
  0x11   :  { %537 = vmatpush.bf16.msra.mxu0 %v921_v3  ;;  %v927_v13 = vld [vmem:[#allocation5 + $0x60] sm:$0xff]  ;;  %v926_v17 = vld [vmem:[#allocation5 + $0x58] sm:$0xff]  ;;  %v917_v20 = vld [vmem:[#allocation5 + $0x10] sm:$0xff] }
  0x12   :  { %551 = vmatpush.bf16.msra.mxu1 %v929_v4  ;;  %v935_v14 = vld [vmem:[#allocation5 + $0xa0] sm:$0xff]  ;;  %v934_v18 = vld [vmem:[#allocation5 + $0x98] sm:$0xff]  ;;  %v925_v21 = vld [vmem:[#allocation5 + $0x50] sm:$0xff] }
  0x13   :  { %565 = vmatpush.bf16.msra.mxu2 %v937_v6  ;;  %v943_v15 = vld [vmem:[#allocation5 + $0xe0] sm:$0xff]  ;;  %v942_v19 = vld [vmem:[#allocation5 + $0xd8] sm:$0xff]  ;;  %v933_v22 = vld [vmem:[#allocation5 + $0x90] sm:$0xff] }
  0x14   :  { %579 = vmatpush.bf16.msra.mxu3 %v945_v7  ;;  %v941_v23 = vld [vmem:[#allocation5 + $0xd0] sm:$0xff]  ;;  %v916_v24 = vld [vmem:[#allocation5 + $0x8] sm:$0xff]  ;;  %v915_v27 = vld [vmem:[#allocation5] sm:$0xff] }
  0x15   :  { %538 = vmatpush.bf16.msra.mxu0 %v920_v8  ;;  %v924_v25 = vld [vmem:[#allocation5 + $0x48] sm:$0xff]  ;;  %v923_v29 = vld [vmem:[#allocation5 + $0x40] sm:$0xff]  ;;  %v954_v31 = vld [vmem:[#allocation5 + $0x138] sm:$0xff] }
  0x16   :  { %552 = vmatpush.bf16.msra.mxu1 %v928_v9  ;;  %v932_v26 = vld [vmem:[#allocation5 + $0x88] sm:$0xff]  ;;  %v931_v30 = vld [vmem:[#allocation5 + $0x80] sm:$0xff]  ;;  %v666_v32 = vld [vmem:[#allocation2 + $0x8] sm:$0xf] }
  0x17   :  { %566 = vmatpush.bf16.msra.mxu2 %v936_v10  ;;  %v940_v28 = vld [vmem:[#allocation5 + $0xc8] sm:$0xff]  ;;  %v911_v34 = vld [vmem:[#allocation2 + $0x18] sm:$0xf0]  ;;  %v962_v38 = vld [vmem:[#allocation5 + $0x178] sm:$0xff] }
  0x18   :  { %580 = vmatpush.bf16.msra.mxu3 %v944_v11  ;;  %v658_v33 = vld [vmem:[#allocation2] sm:$0xf]  ;;  %v912_v35 = vld [vmem:[#allocation2 + $0x20] sm:$0xf0]  ;;  %v970_v39 = vld [vmem:[#allocation5 + $0x1b8] sm:$0xff] }
  0x19   :  { %539 = vmatpush.bf16.msra.mxu0 %v919_v12  ;;  %v908_v36 = vld [vmem:[#allocation2 + $0x4] sm:$0xf]  ;;  %v660_v37 = vld [vmem:[#allocation2 + $0x1c] sm:$0xf0]  ;;  %v939_v40 = vld [vmem:[#allocation5 + $0xc0] sm:$0xff]  ;;  %v659_v41 = vor.u32 %v911_v34, %v658_v33  ;;  %v667_v42 = vor.u32 %v912_v35, %v666_v32 }
  0x1a   :  { %553 = vmatpush.bf16.msra.mxu1 %v927_v13  ;;  %v909_v43 = vld [vmem:[#allocation2 + $0xc] sm:$0xf]  ;;  %v668_v44 = vld [vmem:[#allocation2 + $0x24] sm:$0xf0]  ;;  %v663_v45 = vor.u32 %v908_v36, %v660_v37  ;;  %v952_v50 = vld [vmem:[#allocation5 + $0x128] sm:$0xff] }
  0x1b   :  { %567 = vmatpush.bf16.msra.mxu2 %v935_v14  ;;  %v953_v46 = vld [vmem:[#allocation5 + $0x130] sm:$0xff]  ;;  %v671_v49 = vor.u32 %v909_v43, %v668_v44  ;;  %v960_v51 = vld [vmem:[#allocation5 + $0x168] sm:$0xff]  ;;  %v951_v53 = vld [vmem:[#allocation5 + $0x120] sm:$0xff] }
  0x1c   :  { %581 = vmatpush.bf16.msra.mxu3 %v943_v15  ;;  %v961_v47 = vld [vmem:[#allocation5 + $0x170] sm:$0xff]  ;;  %v968_v52 = vld [vmem:[#allocation5 + $0x1a8] sm:$0xff]  ;;  %v959_v54 = vld [vmem:[#allocation5 + $0x160] sm:$0xff] }
  0x1d   :  { %540 = vmatpush.bf16.msra.mxu0 %v918_v16  ;;  %v969_v48 = vld [vmem:[#allocation5 + $0x1b0] sm:$0xff]  ;;  %v967_v55 = vld [vmem:[#allocation5 + $0x1a0] sm:$0xff]  ;;  %v950_v56 = vld [vmem:[#allocation5 + $0x118] sm:$0xff] }
  0x1e   :  { %554 = vmatpush.bf16.msra.mxu1 %v926_v17  ;;  %v958_v57 = vld [vmem:[#allocation5 + $0x158] sm:$0xff]  ;;  %v949_v59 = vld [vmem:[#allocation5 + $0x110] sm:$0xff]  ;;  %v948_v62 = vld [vmem:[#allocation5 + $0x108] sm:$0xff] }
  0x1f   :  { %568 = vmatpush.bf16.msra.mxu2 %v934_v18  ;;  %v966_v58 = vld [vmem:[#allocation5 + $0x198] sm:$0xff]  ;;  %v957_v60 = vld [vmem:[#allocation5 + $0x150] sm:$0xff]  ;;  %v956_v63 = vld [vmem:[#allocation5 + $0x148] sm:$0xff] }
  0x20   :  { %582 = vmatpush.bf16.msra.mxu3 %v942_v19  ;;  %v965_v61 = vld [vmem:[#allocation5 + $0x190] sm:$0xff]  ;;  %v964_v0 = vld [vmem:[#allocation5 + $0x188] sm:$0xff]  ;;  %v947_v1 = vld [vmem:[#allocation5 + $0x100] sm:$0xff] }
  0x21   :  { %541 = vmatpush.bf16.msra.mxu0 %v917_v20  ;;  %v955_v2 = vld [vmem:[#allocation5 + $0x140] sm:$0xff]  ;;  %v674_v4 = vld [vmem:[#allocation2 + $0x10] sm:$0xf]  ;;  %v913_v5 = vld [vmem:[#allocation2 + $0x28] sm:$0xf0] }
  0x22   :  { %555 = vmatpush.bf16.msra.mxu1 %v925_v21  ;;  %v963_v3 = vld [vmem:[#allocation5 + $0x180] sm:$0xff]  ;;  %v910_v6 = vld [vmem:[#allocation2 + $0x14] sm:$0xf]  ;;  %v676_v7 = vld [vmem:[#allocation2 + $0x2c] sm:$0xf0]  ;;  %v675_v10 = vor.u32 %v913_v5, %v674_v4 }
  0x23   :  { %569 = vmatpush.bf16.msra.mxu2 %v933_v22  ;;  %v682_v8 = vld [vmem:[#allocation2 + $0x18] sm:$0xf]  ;;  %v914_v9 = vld [vmem:[#allocation2 + $0x30] sm:$0xf0]  ;;  %v679_v11 = vor.u32 %v910_v6, %v676_v7 }
  0x24   :  { %583 = vmatpush.bf16.msra.mxu3 %v941_v23  ;;  %v683_v12 = vor.u32 %v914_v9, %v682_v8 }
  0x25   :  { %542 = vmatpush.bf16.msra.mxu0 %v916_v24 }
  0x26   :  { %556 = vmatpush.bf16.msra.mxu1 %v924_v25 }
  0x27   :  { %570 = vmatpush.bf16.msra.mxu2 %v932_v26 }
  0x28   :  { %584 = vmatpush.bf16.msra.mxu3 %v940_v28 }
  0x29   :  { %543 = vmatpush.bf16.msra.mxu0 %v915_v27 }
  0x2a   :  { %557 = vmatpush.bf16.msra.mxu1 %v923_v29 }
  0x2b   :  { %571 = vmatpush.bf16.msra.mxu2 %v931_v30 }
  0x2c   :  { %585 = vmatpush.bf16.msra.mxu3 %v939_v40  ;;  %544 = vmatmul.bf16.vlgmr.msra.gmra.mxu0 %v659_v41 }
  0x2d   :  { %592 = vmatpush.bf16.msrb.mxu0 %v954_v31  ;;  %558 = vmatmul.bf16.vlgmr.msra.gmra.mxu1 %v663_v45 }
  0x2e   :  { %606 = vmatpush.bf16.msrb.mxu1 %v962_v38  ;;  %572 = vmatmul.bf16.vlgmr.msra.gmra.mxu2 %v667_v42 }
  0x2f   :  { %620 = vmatpush.bf16.msrb.mxu2 %v970_v39  ;;  %586 = vmatmul.bf16.vlgmr.msra.gmra.mxu3 %v671_v49 }
  0x31   :  { %593 = vmatpush.bf16.msrb.mxu0 %v953_v46 }
  0x32   :  { %607 = vmatpush.bf16.msrb.mxu1 %v961_v47 }
  0x33   :  { %621 = vmatpush.bf16.msrb.mxu2 %v969_v48 }
  0x35   :  { %594 = vmatpush.bf16.msrb.mxu0 %v952_v50 }
  0x36   :  { %608 = vmatpush.bf16.msrb.mxu1 %v960_v51 }
  0x37   :  { %622 = vmatpush.bf16.msrb.mxu2 %v968_v52 }
  0x39   :  { %595 = vmatpush.bf16.msrb.mxu0 %v951_v53 }
  0x3a   :  { %609 = vmatpush.bf16.msrb.mxu1 %v959_v54 }
  0x3b   :  { %623 = vmatpush.bf16.msrb.mxu2 %v967_v55 }
  0x3d   :  { %596 = vmatpush.bf16.msrb.mxu0 %v950_v56 }
  0x3e   :  { %610 = vmatpush.bf16.msrb.mxu1 %v958_v57 }
  0x3f   :  { %624 = vmatpush.bf16.msrb.mxu2 %v966_v58 }
  0x41   :  { %597 = vmatpush.bf16.msrb.mxu0 %v949_v59 }
  0x42   :  { %611 = vmatpush.bf16.msrb.mxu1 %v957_v60 }
  0x43   :  { %625 = vmatpush.bf16.msrb.mxu2 %v965_v61 }
  0x45   :  { %598 = vmatpush.bf16.msrb.mxu0 %v948_v62 }
  0x46   :  { %612 = vmatpush.bf16.msrb.mxu1 %v956_v63 }
  0x47   :  { %626 = vmatpush.bf16.msrb.mxu2 %v964_v0 }
  0x49   :  { %599 = vmatpush.bf16.msrb.mxu0 %v947_v1 }
  0x4a   :  { %613 = vmatpush.bf16.msrb.mxu1 %v955_v2 }
  0x4b   :  { %627 = vmatpush.bf16.msrb.mxu2 %v963_v3 }
  0x4c   :  { %600 = vmatmul.bf16.vlgmr.msrb.gmra.mxu0 %v675_v10 }
  0x4d   :  { %614 = vmatmul.bf16.vlgmr.msrb.gmra.mxu1 %v679_v11 }
  0x4e   :  { %628 = vmatmul.bf16.vlgmr.msrb.gmra.mxu2 %v683_v12 }
  0xa9   :  { %v545_v13 = vpop.f32.mrf.mxu0 }
  0xaa   :  { %v559_v14 = vpop.f32.mrf.mxu1 }
  0xab   :  { %v560_v16 = vadd.f32 %v559_v14, %v545_v13 }
  0xb1   :  { %v573_v15 = vpop.f32.mrf.mxu2  ;;  %v547_v17 = vpop.f32.mrf.mxu0 }
  0xb2   :  { %v587_v18 = vpop.f32.mrf.mxu3  ;;  %v561_v19 = vpop.f32.mrf.mxu1  ;;  %v574_v20 = vadd.f32 %v573_v15, %v560_v16 }
  0xb3   :  { %v562_v23 = vadd.f32 %v561_v19, %v547_v17 }
  0xb4   :  { %v588_v22 = vadd.f32 %v587_v18, %v574_v20 }
  0xb9   :  { %v575_v21 = vpop.f32.mrf.mxu2 }
  0xba   :  { %v576_v27 = vadd.f32 %v575_v21, %v562_v23  ;;  %v589_v28 = vpop.f32.mrf.mxu3 }
  0xbc   :  { %v590_v31 = vadd.f32 %v589_v28, %v576_v27 }
  0xc9   :  { %v601_v24 = vpop.f32.mrf.mxu0 }
  0xca   :  { %v602_v25 = vadd.f32 %v601_v24, %v588_v22  ;;  %v615_v26 = vpop.f32.mrf.mxu1 }
  0xcc   :  { %v616_v29 = vadd.f32 %v615_v26, %v602_v25 }
  0xd1   :  { %v629_v30 = vpop.f32.mrf.mxu2  ;;  %v603_v33 = vpop.f32.mrf.mxu0 }
  0xd2   :  { %v630_v32 = vadd.f32 %v629_v30, %v616_v29  ;;  %v604_v34 = vadd.f32 %v603_v33, %v590_v31  ;;  %v617_v35 = vpop.f32.mrf.mxu1 }
  0xd4   :  { %634 = vst [vmem:[#allocation7] sm:$0xff] %v630_v32  ;;  %v618_v36 = vadd.f32 %v617_v35, %v604_v34 }
  0xd9   :  { %v631_v37 = vpop.f32.mrf.mxu2 }
  0xda   :  { %v632_v38 = vadd.f32 %v631_v37, %v618_v36 }
  0xdc   :  { %635 = vst [vmem:[#allocation7 + $0x8] sm:$0xff] %v632_v38 }
  0xdd   :  { %648 = dma.vmem_to_hbm [thread:$0]  %s641_s1, 256, %s643_s25, [#allocation4], %s1065_s26, %s1065_s26, %s1066_s27  }
  0xde   :  { %1056 = dma.done.wait [#allocation4], 256  }
  0xdf   :  { %1057 = vsyncadd [#allocation4], 4294967040 }
  0xe0   :  { %653 = vsyncpa [#allocation3], 1 }
  0xe1   :  { %654 = vsyncpa [#allocation6], 1 }
  0xe2   :  { %655 = vsyncpa [#allocation4], 1 }

</bundles_post_ra>
